<compile_context>
chip_gen: v6e
topology: v6e:2x2x1
jax: 0.10.0
libtpu: 0.0.40
codegen_flags: <defaults>
</compile_context>

<pallas_src>
import jax
import jax.numpy as jnp
from jax.experimental import pallas as pl
from jax.experimental.pallas import tpu as pltpu

EPS = 1e-5
LANE = 128
SUBLANE = 8


def _round_up(n, m):
    return ((n + m - 1) // m) * m


def _vmem_capacity_bytes():
    try:
        return int(pltpu.get_tpu_info().vmem_capacity_bytes)
    except Exception:
        return 64 << 20  # conservative (v7x per-TC) if the query is unavailable


def _tile_vmem_bytes(tb, f_pad, h_pad, o_pad):
    """VMEM bytes that scale with the batch tile TB."""
    x_tiles = 2 * 2 * tb * f_pad      # bf16 x tile, double-buffered
    out_tiles = 2 * 4 * tb * o_pad    # f32 out tile, double-buffered
    h_act = (4 + 2) * tb * h_pad      # f32 hidden activation + bf16 matmul operand
    return x_tiles + out_tiles + h_act


def _resident_vmem_bytes(f_pad, h_pad, o_pad):
    """Single-buffered resident weights (bf16) + biases (f32)."""
    return 2 * (f_pad * h_pad + h_pad * o_pad) + 4 * (h_pad + o_pad)


def _choose_tb(batch, f_pad, h_pad, o_pad, budget_bytes):
    tb = min(512, _round_up(batch, SUBLANE))
    # Ensure >= 2 grid steps when there is enough batch, so ("parallel",) can shard
    # across the two v7x TensorCores (no effect on single-TC v5e/v6e).
    if batch >= 2 * SUBLANE:
        tb = min(tb, _round_up(pl.cdiv(batch, 2), SUBLANE))
    tb = max(SUBLANE, _round_up(tb, SUBLANE))
    while tb > SUBLANE and _tile_vmem_bytes(tb, f_pad, h_pad, o_pad) > budget_bytes:
        tb = max(SUBLANE, _round_up(tb // 2, SUBLANE))
    return tb


def simple_nn_kernel(x_ref, w1_ref, b1_ref, w2_ref, b2_ref, out_ref):
    # x_ref: (TB, Fp) bf16 tile; BN affine is already folded into w1/b1 by the wrapper.
    # Matmuls: bf16 operands on the MXU with f32 accumulation; the rest stays f32.
    h = jnp.dot(x_ref[...], w1_ref[...], preferred_element_type=jnp.float32)
    h = jnp.maximum(h + b1_ref[...], 0.0)
    o = jnp.dot(h.astype(jnp.bfloat16), w2_ref[...],
                preferred_element_type=jnp.float32)
    out_ref[...] = jax.nn.sigmoid(o + b2_ref[...])


def simple_nn_forward(vectors, params):
    """vectors: (B, nobjects, nfeat) or (B, ntotal). Returns (B, noutputs) f32."""
    gamma, beta, w1, b1, w2, b2 = params
    B = vectors.shape[0]
    x = vectors.reshape(B, -1).astype(jnp.float32)   # == vectors.reshape(B, -1)
    F = x.shape[1]
    H = w1.shape[1]
    O = w2.shape[1]

    # ---- BatchNorm1d training-mode batch stats in ONE pass over x (both reductions
    # fuse into a single read); biased variance, clamped >= 0 before rsqrt. ----
    mean = jnp.mean(x, axis=0)                                  # (F,)
    mean_sq = jnp.mean(jnp.square(x), axis=0)                   # (F,)
    var = jnp.maximum(mean_sq - jnp.square(mean), 0.0)
    inv_std = jax.lax.rsqrt(var + EPS)
    scale = gamma.reshape(F) * inv_std                          # (F,)
    shift = beta.reshape(F) - mean * scale                      # (F,)
    # TODO(synk): PyTorch training-mode BatchNorm also updates running_mean /
    # running_var (unbiased); only the forward normalization is reproduced.

    # ---- Fold the BN affine into the first linear layer (fold in f32, one bf16 cast). ----
    w1_fold = scale[:, None] * w1                               # (F, H) f32
    b1_fold = b1.reshape(H) + shift @ w1                        # (H,)   f32

    # ---- Pad to lane/sublane friendly shapes (zero padding -> exact result). ----
    Fp = _round_up(F, LANE)
    Hp = _round_up(H, LANE)
    Op = _round_up(O, LANE)

    vmem_cap = _vmem_capacity_bytes()
    resident_bytes = _resident_vmem_bytes(Fp, Hp, Op)
    # TODO(synk): if resident_bytes ever exceeds ~1/3 of VMEM (huge ntotal*hidden on
    # v7x's 64 MiB), a K-tiled grid axis over Fp with an f32 accumulator scratch is
    # needed; not implemented since SimpleNN weights are tiny at realistic sizes.
    usable = (22 << 20) if vmem_cap <= (64 << 20) else (48 << 20)
    budget = max(usable - resident_bytes, 4 << 20)
    TB = _choose_tb(B, Fp, Hp, Op, budget)
    Bp = _round_up(B, TB)

    # x: cast + pad to bf16 in a single fused op (skipped entirely when aligned).
    if B == Bp and F == Fp:
        xp = x.astype(jnp.bfloat16)
    else:
        xp = jnp.zeros((Bp, Fp), jnp.bfloat16).at[:B, :F].set(x.astype(jnp.bfloat16))
    w1_p = jnp.zeros((Fp, Hp), jnp.bfloat16).at[:F, :H].set(w1_fold.astype(jnp.bfloat16))
    b1_p = jnp.zeros((1, Hp), jnp.float32).at[:, :H].set(b1_fold.reshape(1, H))
    w2_p = jnp.zeros((Hp, Op), jnp.bfloat16).at[:H, :O].set(w2.astype(jnp.bfloat16))
    b2_p = jnp.zeros((1, Op), jnp.float32).at[:, :O].set(b2.reshape(1, O))

    grid = (Bp // TB,)

    vmem_limit = int(min(max(resident_bytes + _tile_vmem_bytes(TB, Fp, Hp, Op)
                             + (2 << 20), 16 << 20), vmem_cap))

    flops = int(2 * Bp * (Fp * Hp + Hp * Op) + 2 * Bp * (Hp + Op))
    transcendentals = int(Bp * Op)
    # NOTE: Op padding (O=4 -> 128) amplifies the f32 output write; output kept f32
    # for downstream accuracy, padded columns/rows are sliced off below.
    bytes_accessed = int(2 * Bp * Fp + 4 * Bp * Op
                         + 2 * (Fp * Hp + Hp * Op) + 4 * (Hp + Op))

    def build(single_buffer_weights):
        if single_buffer_weights:
            # Resident operands: block index never changes -> single-buffer to halve
            # their VMEM footprint (double-buffering them buys nothing).
            resident = lambda shape: pl.BlockSpec(
                shape, lambda i: (0, 0), pipeline_mode=pl.Buffered(1))
        else:
            resident = lambda shape: pl.BlockSpec(shape, lambda i: (0, 0))
        return pl.pallas_call(
            simple_nn_kernel,
            out_shape=jax.ShapeDtypeStruct((Bp, Op), jnp.float32),
            grid=grid,
            in_specs=[
                pl.BlockSpec((TB, Fp), lambda i: (i, 0)),  # x streams over batch tiles
                resident((Fp, Hp)),   # w1 (BN-folded, bf16)
                resident((1, Hp)),    # b1 (BN-folded, f32)
                resident((Hp, Op)),   # w2 (bf16)
                resident((1, Op)),    # b2 (f32)
            ],
            out_specs=pl.BlockSpec((TB, Op), lambda i: (i, 0)),
            compiler_params=pltpu.CompilerParams(
                dimension_semantics=("parallel",),
                vmem_limit_bytes=vmem_limit,
            ),
            cost_estimate=pl.CostEstimate(
                flops=flops,
                transcendentals=transcendentals,
                bytes_accessed=bytes_accessed,
            ),
        )

    try:
        out = build(single_buffer_weights=True)(xp, w1_p, b1_p, w2_p, b2_p)
    except Exception:
        # Fallback for jax versions without BlockSpec(pipeline_mode=pl.Buffered(1)).
        out = build(single_buffer_weights=False)(xp, w1_p, b1_p, w2_p, b2_p)

    return out[:B, :O]


def init_params(key, ntotal, hidden, noutputs):
    """Deterministic init matching the PyTorch module's parameter shapes."""
    k1, k2, k3, k4 = jax.random.split(key, 4)
    # BatchNorm1d defaults: weight=1, bias=0
    gamma = jnp.ones((1, ntotal), jnp.float32)
    beta = jnp.zeros((1, ntotal), jnp.float32)
    # Linear init: U(-1/sqrt(fan_in), 1/sqrt(fan_in)); weights stored (in, out)
    lim1 = 1.0 / jnp.sqrt(jnp.float32(ntotal))
    w1 = jax.random.uniform(k1, (ntotal, hidden), jnp.float32, -lim1, lim1)
    b1 = jax.random.uniform(k2, (1, hidden), jnp.float32, -lim1, lim1)
    lim2 = 1.0 / jnp.sqrt(jnp.float32(hidden))
    w2 = jax.random.uniform(k3, (hidden, noutputs), jnp.float32, -lim2, lim2)
    b2 = jax.random.uniform(k4, (1, noutputs), jnp.float32, -lim2, lim2)
    return gamma, beta, w1, b1, w2, b2


def reference_forward(vectors, params):
    """Pure-JAX f32 reference of the PyTorch forward (training-mode BN)."""
    gamma, beta, w1, b1, w2, b2 = params
    B = vectors.shape[0]
    x = vectors.reshape(B, -1).astype(jnp.float32)
    mean = jnp.mean(x, axis=0, keepdims=True)
    var = jnp.mean(jnp.square(x - mean), axis=0, keepdims=True)
    x_hat = (x - mean) * jax.lax.rsqrt(var + EPS)
    x_bn = x_hat * gamma + beta
    h = jnp.maximum(x_bn @ w1 + b1, 0.0)
    return jax.nn.sigmoid(h @ w2 + b2)


if __name__ == "__main__":
    key = jax.random.PRNGKey(0)
    kx, kp = jax.random.split(key)

    # Small shapes: batch=8, 4 objects x 16 features -> ntotal=64, hidden=32, noutputs=4
    B, NOBJ, NFEAT = 8, 4, 16
    NTOTAL = NOBJ * NFEAT
    HIDDEN = 32       # stand-in for fflayers=[200] at small scale
    NOUT = 4

    vectors = jax.random.normal(kx, (B, NOBJ, NFEAT), jnp.float32)
    params = init_params(kp, NTOTAL, HIDDEN, NOUT)

    out = simple_nn_forward(vectors, params)
    jax.block_until_ready(out)

    assert out.shape == (B, NOUT)
    assert bool(jnp.all(jnp.isfinite(out)))
    assert bool(jnp.all((out >= 0.0) & (out <= 1.0)))  # sigmoid output range

    # Validate against f32 reference (bf16 x / matmul operands -> loose tolerance).
    ref = reference_forward(vectors, params)
    assert bool(jnp.allclose(out, ref, atol=2.5e-2, rtol=0.0)), (
        float(jnp.max(jnp.abs(out - ref))))

    print("KERNEL_OK")
</pallas_src>

<mosaic_0001>
module attributes {stable_mosaic.version = 11 : i64} {
  func.func @simple_nn_kernel(%arg0: i32, %arg1: memref<8x128xbf16, #tpu.memory_space<vmem>>, %arg2: memref<128x128xbf16, #tpu.memory_space<vmem>>, %arg3: memref<1x128xf32, #tpu.memory_space<vmem>>, %arg4: memref<128x128xbf16, #tpu.memory_space<vmem>>, %arg5: memref<1x128xf32, #tpu.memory_space<vmem>>, %arg6: memref<8x128xf32, #tpu.memory_space<vmem>>) attributes {dimension_semantics = [#tpu.dimension_semantics<parallel>], iteration_bounds = array<i64: 1>, scalar_prefetch = 0 : i64, scratch_operands = 0 : i64, tpu.core_type = #tpu.core_type<tc>, window_params = [{transform_indices = @transform_0, window_bounds = array<i64: 8, 128>}, {pipeline_mode = #tpu.pipeline_mode<synchronous>, transform_indices = @transform_1, window_bounds = array<i64: 128, 128>}, {pipeline_mode = #tpu.pipeline_mode<synchronous>, transform_indices = @transform_2, window_bounds = array<i64: 1, 128>}, {pipeline_mode = #tpu.pipeline_mode<synchronous>, transform_indices = @transform_3, window_bounds = array<i64: 128, 128>}, {pipeline_mode = #tpu.pipeline_mode<synchronous>, transform_indices = @transform_4, window_bounds = array<i64: 1, 128>}, {transform_indices = @transform_5, window_bounds = array<i64: 8, 128>}]} {
    %c0 = arith.constant 0 : index
    %c0_0 = arith.constant 0 : index
    %0 = vector.load %arg1[%c0, %c0_0] : memref<8x128xbf16, #tpu.memory_space<vmem>>, vector<8x128xbf16>
    %c0_1 = arith.constant 0 : index
    %c0_2 = arith.constant 0 : index
    %1 = vector.load %arg2[%c0_1, %c0_2] : memref<128x128xbf16, #tpu.memory_space<vmem>>, vector<128x128xbf16>
    %cst = arith.constant dense<0.000000e+00> : vector<8x128xf32>
    %2 = tpu.matmul %0, %1, %cst {dimension_numbers = #tpu.dot_dimension_numbers<[1], [0], [0], [1], [0, 0, 1, 1], [], []>} : vector<8x128xbf16>, vector<128x128xbf16>, vector<8x128xf32> -> vector<8x128xf32>
    %c0_3 = arith.constant 0 : index
    %c0_4 = arith.constant 0 : index
    %3 = vector.load %arg3[%c0_3, %c0_4] : memref<1x128xf32, #tpu.memory_space<vmem>>, vector<1x128xf32>
    %4 = vector.broadcast %3 : vector<1x128xf32> to vector<8x128xf32>
    %5 = arith.addf %2, %4 : vector<8x128xf32>
    %cst_5 = arith.constant 0.000000e+00 : f32
    %6 = vector.broadcast %cst_5 : f32 to vector<8x128xf32>
    %7 = arith.maximumf %5, %6 : vector<8x128xf32>
    %8 = arith.truncf %7 : vector<8x128xf32> to vector<8x128xbf16>
    %c0_6 = arith.constant 0 : index
    %c0_7 = arith.constant 0 : index
    %9 = vector.load %arg4[%c0_6, %c0_7] : memref<128x128xbf16, #tpu.memory_space<vmem>>, vector<128x128xbf16>
    %cst_8 = arith.constant dense<0.000000e+00> : vector<8x128xf32>
    %10 = tpu.matmul %8, %9, %cst_8 {dimension_numbers = #tpu.dot_dimension_numbers<[1], [0], [0], [1], [0, 0, 1, 1], [], []>} : vector<8x128xbf16>, vector<128x128xbf16>, vector<8x128xf32> -> vector<8x128xf32>
    %c0_9 = arith.constant 0 : index
    %c0_10 = arith.constant 0 : index
    %11 = vector.load %arg5[%c0_9, %c0_10] : memref<1x128xf32, #tpu.memory_space<vmem>>, vector<1x128xf32>
    %12 = vector.broadcast %11 : vector<1x128xf32> to vector<8x128xf32>
    %13 = arith.addf %10, %12 : vector<8x128xf32>
    %14 = arith.negf %13 : vector<8x128xf32>
    %15 = math.exp %14 : vector<8x128xf32>
    %cst_11 = arith.constant 1.000000e+00 : f32
    %16 = vector.broadcast %cst_11 : f32 to vector<8x128xf32>
    %17 = arith.addf %16, %15 : vector<8x128xf32>
    %18 = arith.divf %16, %17 : vector<8x128xf32>
    %c0_12 = arith.constant 0 : index
    %c0_13 = arith.constant 0 : index
    %19 = vector.load %arg6[%c0_12, %c0_13] : memref<8x128xf32, #tpu.memory_space<vmem>>, vector<8x128xf32>
    tpu.vector_store %arg6[%c0_12, %c0_13], %18 {strides = array<i32>} : memref<8x128xf32, #tpu.memory_space<vmem>>, vector<8x128xf32>,
    return
  }
  func.func @transform_0(%arg0: i32) -> (i32, i32) {
    %c0_i32 = arith.constant 0 : i32
    %c0_i32_0 = arith.constant 0 : i32
    return %arg0, %c0_i32 : i32, i32
  }
  func.func @transform_1(%arg0: i32) -> (i32, i32) {
    %c0_i32 = arith.constant 0 : i32
    %c0_i32_0 = arith.constant 0 : i32
    %c0_i32_1 = arith.constant 0 : i32
    return %c0_i32, %c0_i32_0 : i32, i32
  }
  func.func @transform_2(%arg0: i32) -> (i32, i32) {
    %c0_i32 = arith.constant 0 : i32
    %c0_i32_0 = arith.constant 0 : i32
    %c0_i32_1 = arith.constant 0 : i32
    return %c0_i32, %c0_i32_0 : i32, i32
  }
  func.func @transform_3(%arg0: i32) -> (i32, i32) {
    %c0_i32 = arith.constant 0 : i32
    %c0_i32_0 = arith.constant 0 : i32
    %c0_i32_1 = arith.constant 0 : i32
    return %c0_i32, %c0_i32_0 : i32, i32
  }
  func.func @transform_4(%arg0: i32) -> (i32, i32) {
    %c0_i32 = arith.constant 0 : i32
    %c0_i32_0 = arith.constant 0 : i32
    %c0_i32_1 = arith.constant 0 : i32
    return %c0_i32, %c0_i32_0 : i32, i32
  }
  func.func @transform_5(%arg0: i32) -> (i32, i32) {
    %c0_i32 = arith.constant 0 : i32
    %c0_i32_0 = arith.constant 0 : i32
    return %arg0, %c0_i32 : i32, i32
  }
}

module attributes {stable_mosaic.version = 11 : i64} {
  func.func @simple_nn_kernel(%arg0: i32, %arg1: memref<8x128xbf16, #tpu.memory_space<vmem>>, %arg2: memref<128x128xbf16, #tpu.memory_space<vmem>>, %arg3: memref<1x128xf32, #tpu.memory_space<vmem>>, %arg4: memref<128x128xbf16, #tpu.memory_space<vmem>>, %arg5: memref<1x128xf32, #tpu.memory_space<vmem>>, %arg6: memref<8x128xf32, #tpu.memory_space<vmem>>) attributes {dimension_semantics = [#tpu.dimension_semantics<parallel>], iteration_bounds = array<i64: 1>, scalar_prefetch = 0 : i64, scratch_operands = 0 : i64, tpu.core_type = #tpu.core_type<tc>, window_params = [{transform_indices = @transform_0, window_bounds = array<i64: 8, 128>}, {pipeline_mode = #tpu.pipeline_mode<synchronous>, transform_indices = @transform_1, window_bounds = array<i64: 128, 128>}, {pipeline_mode = #tpu.pipeline_mode<synchronous>, transform_indices = @transform_2, window_bounds = array<i64: 1, 128>}, {pipeline_mode = #tpu.pipeline_mode<synchronous>, transform_indices = @transform_3, window_bounds = array<i64: 128, 128>}, {pipeline_mode = #tpu.pipeline_mode<synchronous>, transform_indices = @transform_4, window_bounds = array<i64: 1, 128>}, {transform_indices = @transform_5, window_bounds = array<i64: 8, 128>}]} {
    %c0 = arith.constant 0 : index
    %c0_0 = arith.constant 0 : index
    %0 = vector.load %arg1[%c0, %c0_0] : memref<8x128xbf16, #tpu.memory_space<vmem>>, vector<8x128xbf16>
    %c0_1 = arith.constant 0 : index
    %c0_2 = arith.constant 0 : index
    %1 = vector.load %arg2[%c0_1, %c0_2] : memref<128x128xbf16, #tpu.memory_space<vmem>>, vector<128x128xbf16>
    %cst = arith.constant dense<0.000000e+00> : vector<8x128xf32>
    %2 = tpu.matmul %0, %1, %cst {dimension_numbers = #tpu.dot_dimension_numbers<[1], [0], [0], [1], [0, 0, 1, 1], [], []>} : vector<8x128xbf16>, vector<128x128xbf16>, vector<8x128xf32> -> vector<8x128xf32>
    %c0_3 = arith.constant 0 : index
    %c0_4 = arith.constant 0 : index
    %3 = vector.load %arg3[%c0_3, %c0_4] : memref<1x128xf32, #tpu.memory_space<vmem>>, vector<1x128xf32>
    %4 = vector.broadcast %3 : vector<1x128xf32> to vector<8x128xf32>
    %5 = arith.addf %2, %4 : vector<8x128xf32>
    %cst_5 = arith.constant 0.000000e+00 : f32
    %6 = vector.broadcast %cst_5 : f32 to vector<8x128xf32>
    %7 = arith.maximumf %5, %6 : vector<8x128xf32>
    %8 = arith.truncf %7 : vector<8x128xf32> to vector<8x128xbf16>
    %c0_6 = arith.constant 0 : index
    %c0_7 = arith.constant 0 : index
    %9 = vector.load %arg4[%c0_6, %c0_7] : memref<128x128xbf16, #tpu.memory_space<vmem>>, vector<128x128xbf16>
    %cst_8 = arith.constant dense<0.000000e+00> : vector<8x128xf32>
    %10 = tpu.matmul %8, %9, %cst_8 {dimension_numbers = #tpu.dot_dimension_numbers<[1], [0], [0], [1], [0, 0, 1, 1], [], []>} : vector<8x128xbf16>, vector<128x128xbf16>, vector<8x128xf32> -> vector<8x128xf32>
    %c0_9 = arith.constant 0 : index
    %c0_10 = arith.constant 0 : index
    %11 = vector.load %arg5[%c0_9, %c0_10] : memref<1x128xf32, #tpu.memory_space<vmem>>, vector<1x128xf32>
    %12 = vector.broadcast %11 : vector<1x128xf32> to vector<8x128xf32>
    %13 = arith.addf %10, %12 : vector<8x128xf32>
    %14 = arith.negf %13 : vector<8x128xf32>
    %15 = math.exp %14 : vector<8x128xf32>
    %cst_11 = arith.constant 1.000000e+00 : f32
    %16 = vector.broadcast %cst_11 : f32 to vector<8x128xf32>
    %17 = arith.addf %16, %15 : vector<8x128xf32>
    %18 = arith.divf %16, %17 : vector<8x128xf32>
    %c0_12 = arith.constant 0 : index
    %c0_13 = arith.constant 0 : index
    %19 = vector.load %arg6[%c0_12, %c0_13] : memref<8x128xf32, #tpu.memory_space<vmem>>, vector<8x128xf32>
    tpu.vector_store %arg6[%c0_12, %c0_13], %18 {strides = array<i32>} : memref<8x128xf32, #tpu.memory_space<vmem>>, vector<8x128xf32>,
    return
  }
  func.func @transform_0(%arg0: i32) -> (i32, i32) {
    %c0_i32 = arith.constant 0 : i32
    %c0_i32_0 = arith.constant 0 : i32
    return %arg0, %c0_i32 : i32, i32
  }
  func.func @transform_1(%arg0: i32) -> (i32, i32) {
    %c0_i32 = arith.constant 0 : i32
    %c0_i32_0 = arith.constant 0 : i32
    %c0_i32_1 = arith.constant 0 : i32
    return %c0_i32, %c0_i32_0 : i32, i32
  }
  func.func @transform_2(%arg0: i32) -> (i32, i32) {
    %c0_i32 = arith.constant 0 : i32
    %c0_i32_0 = arith.constant 0 : i32
    %c0_i32_1 = arith.constant 0 : i32
    return %c0_i32, %c0_i32_0 : i32, i32
  }
  func.func @transform_3(%arg0: i32) -> (i32, i32) {
    %c0_i32 = arith.constant 0 : i32
    %c0_i32_0 = arith.constant 0 : i32
    %c0_i32_1 = arith.constant 0 : i32
    return %c0_i32, %c0_i32_0 : i32, i32
  }
  func.func @transform_4(%arg0: i32) -> (i32, i32) {
    %c0_i32 = arith.constant 0 : i32
    %c0_i32_0 = arith.constant 0 : i32
    %c0_i32_1 = arith.constant 0 : i32
    return %c0_i32, %c0_i32_0 : i32, i32
  }
  func.func @transform_5(%arg0: i32) -> (i32, i32) {
    %c0_i32 = arith.constant 0 : i32
    %c0_i32_0 = arith.constant 0 : i32
    return %arg0, %c0_i32 : i32, i32
  }
}

</mosaic_0001>

<bundles_post_ra>
// kernel: tpu_custom_call.1
= control target key start
LH: loop header
LB: loop body
LE: loop exit
PB: predicated region body
PF: predicated region fallthrough
CT: control target
= control target key end

     0   :  { %10 = vsyncpa [#allocation3], 0  ;;  %s556_s0 = inlined_call_operand.hbm [shape: bf16[8,128], index: 0, kind: input, shape index: {}]   ;;  %s557_s1 = inlined_call_operand.hbm [shape: bf16[128,128], index: 1, kind: input, shape index: {}]   ;;  %s558_s2 = inlined_call_operand.vmem [shape: f32[1,128], index: 2, kind: input, shape index: {}]   ;;  %s559_s3 = inlined_call_operand.hbm [shape: bf16[128,128], index: 3, kind: input, shape index: {}]   ;;  %s560_s4 = inlined_call_operand.vmem [shape: f32[1,128], index: 4, kind: input, shape index: {}]   ;;  %s561_s5 = inlined_call_operand.hbm [shape: f32[8,128], index: 5, kind: output, shape index: {}]  }
   0x1   :  { %11 = vsyncpa [#allocation6], 0 }
   0x2   :  { %12 = vsyncpa [#allocation4], 0  ;;  %s500_s18 = smov [#allocation5]  }
   0x3   :  { %s28_s19 = sshll.u32 %s500_s18, 4  ;;  %s29_s19 = int_to_ptr.vmem [resolvable:$true] %s28_s19 }
   0x4   :  { %s422_s20 = scalar_lea.vmem %s29_s19, 1024  ;;  %p427_p1 = scmp.lt.s32.totalorder %s29_s19, %s29_s19 }
   0x5   :  { %p423_p0 = scmp.ne.s32.totalorder %s29_s19, %s422_s20  ;;  %p428_p2 = scmp.lt.s32.totalorder %s422_s20, %s422_s20 }
   0x7   :  { %p429_p3 = por %p428_p2, %p427_p1 }
   0x9   :  { %p430_p4 = pnand %p429_p3, %p423_p0 }
   0xb   :  { %433 = shalt.err (!%p430_p4)
}
   0xc   :  { %s501_s21 = smov 64   ;;  %s502_s22 = smov 4  }
   0xd   :  { %34 = dma.hbm_to_vmem [thread:$0]  %s557_s1, 1024, %s29_s19, [#allocation6], %s501_s21, %s501_s21, %s502_s22  }
   0xe   :  { %s503_s25 = smov [#allocation2]   ;;  %s504_s27 = smov [#allocation7]  }
   0xf   :  { %s19_s26 = sshll.u32 %s503_s25, 4  ;;  %s42_s28 = sshll.u32 %s504_s27, 4  ;;  %s20_s26 = int_to_ptr.vmem [resolvable:$true] %s19_s26  ;;  %s43_s28 = int_to_ptr.vmem [resolvable:$true] %s42_s28 }
  0x10   :  { %s442_s29 = scalar_lea.vmem %s20_s26, 64  ;;  %p447_p6 = scmp.lt.s32.totalorder %s20_s26, %s20_s26 }
  0x11   :  { %p443_p5 = scmp.ne.s32.totalorder %s20_s26, %s442_s29  ;;  %p448_p7 = scmp.lt.s32.totalorder %s442_s29, %s442_s29 }
  0x13   :  { %p449_p8 = por %p448_p7, %p447_p6 }
  0x15   :  { %p450_p9 = pnand %p449_p8, %p443_p5 }
  0x17   :  { %453 = shalt.err (!%p450_p9)
}
  0x18   :  { %22 = dma.hbm_to_vmem [thread:$0]  %s556_s0, 64, %s20_s26, [#allocation3]  }
  0x19   :  { %s462_s7 = scalar_lea.vmem %s43_s28, 1024  ;;  %p467_p11 = scmp.lt.s32.totalorder %s43_s28, %s43_s28 }
  0x1a   :  { %p463_p10 = scmp.ne.s32.totalorder %s43_s28, %s462_s7  ;;  %p468_p12 = scmp.lt.s32.totalorder %s462_s7, %s462_s7 }
  0x1c   :  { %p469_p13 = por %p468_p12, %p467_p11 }
  0x1e   :  { %p470_p0 = pnand %p469_p13, %p463_p10 }
  0x20   :  { %473 = shalt.err (!%p470_p0)
}
  0x21   :  { %48 = dma.hbm_to_vmem [thread:$0]  %s559_s3, 1024, %s43_s28, [#allocation6], %s501_s21, %s501_s21, %s502_s22  }
  0x22   :  { %494 = dma.done.wait [#allocation3], 64  }
  0x23   :  { %495 = vsyncadd [#allocation3], 4294967232 }
  0x24   :  { %496 = dma.done.wait [#allocation6], 2048  }
  0x25   :  { %497 = vsyncadd [#allocation6], 4294965248  ;;  %v505_v0 = vmov 0.0   ;;  %vm506_vm0 = vmmov 0   ;;  %v394_v1 = vld [vmem:[#allocation5 + $0x38] sm:$0xff]   ;;  %v395_v2 = vld [vmem:[#allocation5 + $0x30] sm:$0xff]  }
  0x26   :  { %346 = vmatprep.subr.bf16.mxu0 %v505_v0  ;;  %362 = vmatprep.mubr.msk.bf16.mxu0 %vm506_vm0, %v505_v0  ;;  %v396_v3 = vld [vmem:[#allocation5 + $0x28] sm:$0xff]   ;;  %v402_v4 = vld [vmem:[#allocation7 + $0x38] sm:$0xff]   ;;  %v397_v5 = vld [vmem:[#allocation5 + $0x20] sm:$0xff]  }
  0x27   :  { %366 = vmatprep.subr.bf16.mxu1 %v505_v0  ;;  %382 = vmatprep.mubr.msk.bf16.mxu1 %vm506_vm0, %v505_v0  ;;  %v403_v6 = vld [vmem:[#allocation7 + $0x30] sm:$0xff]   ;;  %v398_v7 = vld [vmem:[#allocation5 + $0x18] sm:$0xff]   ;;  %v404_v8 = vld [vmem:[#allocation7 + $0x28] sm:$0xff]  }
  0x28   :  { %347 = vmatpush3.bf16.msra.mxu0 %v394_v1  ;;  %367 = vmatpush3.bf16.msra.mxu1 %v402_v4  ;;  %v399_v9 = vld [vmem:[#allocation5 + $0x10] sm:$0xff]   ;;  %v405_v10 = vld [vmem:[#allocation7 + $0x20] sm:$0xff]   ;;  %v400_v11 = vld [vmem:[#allocation5 + $0x8] sm:$0xff]  }
  0x29   :  { %348 = vmatprep.subr.bf16.mxu0 %v505_v0  ;;  %368 = vmatprep.subr.bf16.mxu1 %v505_v0  ;;  %v406_v12 = vld [vmem:[#allocation7 + $0x18] sm:$0xff]   ;;  %v401_v13 = vld [vmem:[#allocation5] sm:$0xff]   ;;  %v407_v14 = vld [vmem:[#allocation7 + $0x10] sm:$0xff]  }
  0x2a   :  { %v61_v15 = vld [vmem:[#allocation2] sm:$0xf]  ;;  %v408_v16 = vld [vmem:[#allocation7 + $0x8] sm:$0xff]   ;;  %v409_v17 = vld [vmem:[#allocation7] sm:$0xff]  }
  0x2b   :  { %v309_v18 = vld [vmem:[%s558_s2] ss:$0 sm:$0xff]  ;;  %s507_s2 = smov [#allocation8]  }
  0x2c   :  { %349 = vmatpush3.bf16.msra.mxu0 %v395_v2  ;;  %369 = vmatpush3.bf16.msra.mxu1 %v403_v6  ;;  %v318_v26 = vld [vmem:[%s560_s4] ss:$0 sm:$0xff]  ;;  %s299_s11 = sshll.u32 %s507_s2, 4  ;;  %s300_s11 = int_to_ptr.vmem [resolvable:$true] %s299_s11 }
  0x2d   :  { %350 = vmatprep.subr.bf16.mxu0 %v505_v0  ;;  %370 = vmatprep.subr.bf16.mxu1 %v505_v0  ;;  %s474_s12 = scalar_lea.vmem %s300_s11, 128  ;;  %p479_p2 = scmp.lt.s32.totalorder %s300_s11, %s300_s11 }
  0x2e   :  { %p475_p1 = scmp.ne.s32.totalorder %s300_s11, %s474_s12  ;;  %p480_p3 = scmp.lt.s32.totalorder %s474_s12, %s474_s12 }
  0x30   :  { %351 = vmatpush3.bf16.msra.mxu0 %v396_v3  ;;  %371 = vmatpush3.bf16.msra.mxu1 %v404_v8  ;;  %p481_p4 = por %p480_p3, %p479_p2 }
  0x31   :  { %352 = vmatprep.subr.bf16.mxu0 %v505_v0  ;;  %372 = vmatprep.subr.bf16.mxu1 %v505_v0 }
  0x32   :  { %p482_p5 = pnand %p481_p4, %p475_p1 }
  0x34   :  { %353 = vmatpush3.bf16.msra.mxu0 %v397_v5  ;;  %373 = vmatpush3.bf16.msra.mxu1 %v405_v10 }
  0x35   :  { %354 = vmatprep.subr.bf16.mxu0 %v505_v0  ;;  %374 = vmatprep.subr.bf16.mxu1 %v505_v0 }
  0x38   :  { %355 = vmatpush3.bf16.msra.mxu0 %v398_v7  ;;  %375 = vmatpush3.bf16.msra.mxu1 %v406_v12 }
  0x39   :  { %356 = vmatprep.subr.bf16.mxu0 %v505_v0  ;;  %376 = vmatprep.subr.bf16.mxu1 %v505_v0 }
  0x3c   :  { %357 = vmatpush3.bf16.msra.mxu0 %v399_v9  ;;  %377 = vmatpush3.bf16.msra.mxu1 %v407_v14 }
  0x3d   :  { %358 = vmatprep.subr.bf16.mxu0 %v505_v0  ;;  %378 = vmatprep.subr.bf16.mxu1 %v505_v0 }
  0x40   :  { %359 = vmatpush3.bf16.msra.mxu0 %v400_v11  ;;  %379 = vmatpush3.bf16.msra.mxu1 %v408_v16 }
  0x41   :  { %360 = vmatprep.subr.bf16.mxu0 %v505_v0  ;;  %380 = vmatprep.subr.bf16.mxu1 %v505_v0 }
  0x44   :  { %361 = vmatpush3.bf16.msra.mxu0 %v401_v13  ;;  %381 = vmatpush3.bf16.msra.mxu1 %v409_v17 }
  0x47   :  { %363 = vmatmul.mubr.bf16.vlgmr.msra.gmra.mxu0 %v61_v15 }
 0x107   :  { %v167_v19 = vpop.f32.mrf.mxu0 }
 0x108   :  { %v168_v20 = vadd.f32 %v309_v18, %v167_v19 }
 0x109   :  { %v364_v21 = vpop.f32.mrf.mxu0 }
 0x10a   :  { %v173_v22 = vmax.f32 %v168_v20, 0.0 }
 0x10b   :  { %v170_v23 = vpop.f32.mrf.mxu0 }
 0x10c   :  { %v174_v24 = vpack.c.bf16 %v173_v22, %v173_v22 }
 0x10d   :  { %v365_v25 = vpop.f32.mrf.mxu0 }
 0x10e   :  { %383 = vmatmul.mubr.bf16.vlgmr.msra.gmra.mxu1 %v174_v24 }
 0x1ce   :  { %v280_v27 = vpop.f32.mrf.mxu1 }
 0x1cf   :  { %v281_v28 = vadd.f32 %v318_v26, %v280_v27 }
 0x1d0   :  { %v384_v29 = vpop.f32.mrf.mxu1 }
 0x1d1   :  { %v327_v30 = vmul.f32 -1.442695, %v281_v28 }
 0x1d2   :  { %v283_v31 = vpop.f32.mrf.mxu1 }
 0x1d3   :  { %410 = vpow2.f32 %v327_v30 }
 0x1d4   :  { %v385_v32 = vpop.f32.mrf.mxu1 }
 0x1e0   :  { %v411_v33 = vpop.eup %410 }
 0x1e1   :  { %v289_v34 = vadd.f32 1.0, %v411_v33 }
 0x1e3   :  { %412 = vrcp.f32 %v289_v34 }
 0x1f0   :  { %v413_v35 = vpop.eup %412 }
 0x1f1   :  { %292 = vst [vmem:[#allocation8] sm:$0xff] %v413_v35 }
 0x1f2   :  { %485 = shalt.err (!%p482_p5)
}
 0x1f3   :  { %302 = dma.vmem_to_hbm [thread:$0]  %s300_s11, 128, %s561_s5, [#allocation4]  }
 0x1f4   :  { %498 = dma.done.wait [#allocation4], 128  }
 0x1f5   :  { %499 = vsyncadd [#allocation4], 4294967168 }
 0x1f6   :  { %306 = vsyncpa [#allocation3], 1 }
 0x1f7   :  { %307 = vsyncpa [#allocation6], 1 }
 0x1f8   :  { %308 = vsyncpa [#allocation4], 1 }

// kernel: tpu_custom_call.1
= control target key start
LH: loop header
LB: loop body
LE: loop exit
PB: predicated region body
PF: predicated region fallthrough
CT: control target
= control target key end

     0   :  { %10 = vsyncpa [#allocation3], 0  ;;  %s556_s0 = inlined_call_operand.hbm [shape: bf16[8,128], index: 0, kind: input, shape index: {}]   ;;  %s557_s1 = inlined_call_operand.hbm [shape: bf16[128,128], index: 1, kind: input, shape index: {}]   ;;  %s558_s2 = inlined_call_operand.vmem [shape: f32[1,128], index: 2, kind: input, shape index: {}]   ;;  %s559_s3 = inlined_call_operand.hbm [shape: bf16[128,128], index: 3, kind: input, shape index: {}]   ;;  %s560_s4 = inlined_call_operand.vmem [shape: f32[1,128], index: 4, kind: input, shape index: {}]   ;;  %s561_s5 = inlined_call_operand.hbm [shape: f32[8,128], index: 5, kind: output, shape index: {}]  }
   0x1   :  { %11 = vsyncpa [#allocation6], 0 }
   0x2   :  { %12 = vsyncpa [#allocation4], 0  ;;  %s500_s18 = smov [#allocation5]  }
   0x3   :  { %s28_s19 = sshll.u32 %s500_s18, 4  ;;  %s29_s19 = int_to_ptr.vmem [resolvable:$true] %s28_s19 }
   0x4   :  { %s422_s20 = scalar_lea.vmem %s29_s19, 1024  ;;  %p427_p1 = scmp.lt.s32.totalorder %s29_s19, %s29_s19 }
   0x5   :  { %p423_p0 = scmp.ne.s32.totalorder %s29_s19, %s422_s20  ;;  %p428_p2 = scmp.lt.s32.totalorder %s422_s20, %s422_s20 }
   0x7   :  { %p429_p3 = por %p428_p2, %p427_p1 }
   0x9   :  { %p430_p4 = pnand %p429_p3, %p423_p0 }
   0xb   :  { %433 = shalt.err (!%p430_p4)
}
   0xc   :  { %s501_s21 = smov 64   ;;  %s502_s22 = smov 4  }
   0xd   :  { %34 = dma.hbm_to_vmem [thread:$0]  %s557_s1, 1024, %s29_s19, [#allocation6], %s501_s21, %s501_s21, %s502_s22  }
   0xe   :  { %s503_s25 = smov [#allocation2]   ;;  %s504_s27 = smov [#allocation7]  }
   0xf   :  { %s19_s26 = sshll.u32 %s503_s25, 4  ;;  %s42_s28 = sshll.u32 %s504_s27, 4  ;;  %s20_s26 = int_to_ptr.vmem [resolvable:$true] %s19_s26  ;;  %s43_s28 = int_to_ptr.vmem [resolvable:$true] %s42_s28 }
  0x10   :  { %s442_s29 = scalar_lea.vmem %s20_s26, 64  ;;  %p447_p6 = scmp.lt.s32.totalorder %s20_s26, %s20_s26 }
  0x11   :  { %p443_p5 = scmp.ne.s32.totalorder %s20_s26, %s442_s29  ;;  %p448_p7 = scmp.lt.s32.totalorder %s442_s29, %s442_s29 }
  0x13   :  { %p449_p8 = por %p448_p7, %p447_p6 }
  0x15   :  { %p450_p9 = pnand %p449_p8, %p443_p5 }
  0x17   :  { %453 = shalt.err (!%p450_p9)
}
  0x18   :  { %22 = dma.hbm_to_vmem [thread:$0]  %s556_s0, 64, %s20_s26, [#allocation3]  }
  0x19   :  { %s462_s7 = scalar_lea.vmem %s43_s28, 1024  ;;  %p467_p11 = scmp.lt.s32.totalorder %s43_s28, %s43_s28 }
  0x1a   :  { %p463_p10 = scmp.ne.s32.totalorder %s43_s28, %s462_s7  ;;  %p468_p12 = scmp.lt.s32.totalorder %s462_s7, %s462_s7 }
  0x1c   :  { %p469_p13 = por %p468_p12, %p467_p11 }
  0x1e   :  { %p470_p0 = pnand %p469_p13, %p463_p10 }
  0x20   :  { %473 = shalt.err (!%p470_p0)
}
  0x21   :  { %48 = dma.hbm_to_vmem [thread:$0]  %s559_s3, 1024, %s43_s28, [#allocation6], %s501_s21, %s501_s21, %s502_s22  }
  0x22   :  { %494 = dma.done.wait [#allocation3], 64  }
  0x23   :  { %495 = vsyncadd [#allocation3], 4294967232 }
  0x24   :  { %496 = dma.done.wait [#allocation6], 2048  }
  0x25   :  { %497 = vsyncadd [#allocation6], 4294965248  ;;  %v505_v0 = vmov 0.0   ;;  %vm506_vm0 = vmmov 0   ;;  %v394_v1 = vld [vmem:[#allocation5 + $0x38] sm:$0xff]   ;;  %v395_v2 = vld [vmem:[#allocation5 + $0x30] sm:$0xff]  }
  0x26   :  { %346 = vmatprep.subr.bf16.mxu0 %v505_v0  ;;  %362 = vmatprep.mubr.msk.bf16.mxu0 %vm506_vm0, %v505_v0  ;;  %v396_v3 = vld [vmem:[#allocation5 + $0x28] sm:$0xff]   ;;  %v402_v4 = vld [vmem:[#allocation7 + $0x38] sm:$0xff]   ;;  %v397_v5 = vld [vmem:[#allocation5 + $0x20] sm:$0xff]  }
  0x27   :  { %366 = vmatprep.subr.bf16.mxu1 %v505_v0  ;;  %382 = vmatprep.mubr.msk.bf16.mxu1 %vm506_vm0, %v505_v0  ;;  %v403_v6 = vld [vmem:[#allocation7 + $0x30] sm:$0xff]   ;;  %v398_v7 = vld [vmem:[#allocation5 + $0x18] sm:$0xff]   ;;  %v404_v8 = vld [vmem:[#allocation7 + $0x28] sm:$0xff]  }
  0x28   :  { %347 = vmatpush3.bf16.msra.mxu0 %v394_v1  ;;  %367 = vmatpush3.bf16.msra.mxu1 %v402_v4  ;;  %v399_v9 = vld [vmem:[#allocation5 + $0x10] sm:$0xff]   ;;  %v405_v10 = vld [vmem:[#allocation7 + $0x20] sm:$0xff]   ;;  %v400_v11 = vld [vmem:[#allocation5 + $0x8] sm:$0xff]  }
  0x29   :  { %348 = vmatprep.subr.bf16.mxu0 %v505_v0  ;;  %368 = vmatprep.subr.bf16.mxu1 %v505_v0  ;;  %v406_v12 = vld [vmem:[#allocation7 + $0x18] sm:$0xff]   ;;  %v401_v13 = vld [vmem:[#allocation5] sm:$0xff]   ;;  %v407_v14 = vld [vmem:[#allocation7 + $0x10] sm:$0xff]  }
  0x2a   :  { %v61_v15 = vld [vmem:[#allocation2] sm:$0xf]  ;;  %v408_v16 = vld [vmem:[#allocation7 + $0x8] sm:$0xff]   ;;  %v409_v17 = vld [vmem:[#allocation7] sm:$0xff]  }
  0x2b   :  { %v309_v18 = vld [vmem:[%s558_s2] ss:$0 sm:$0xff]  ;;  %s507_s2 = smov [#allocation8]  }
  0x2c   :  { %349 = vmatpush3.bf16.msra.mxu0 %v395_v2  ;;  %369 = vmatpush3.bf16.msra.mxu1 %v403_v6  ;;  %v318_v26 = vld [vmem:[%s560_s4] ss:$0 sm:$0xff]  ;;  %s299_s11 = sshll.u32 %s507_s2, 4  ;;  %s300_s11 = int_to_ptr.vmem [resolvable:$true] %s299_s11 }
  0x2d   :  { %350 = vmatprep.subr.bf16.mxu0 %v505_v0  ;;  %370 = vmatprep.subr.bf16.mxu1 %v505_v0  ;;  %s474_s12 = scalar_lea.vmem %s300_s11, 128  ;;  %p479_p2 = scmp.lt.s32.totalorder %s300_s11, %s300_s11 }
  0x2e   :  { %p475_p1 = scmp.ne.s32.totalorder %s300_s11, %s474_s12  ;;  %p480_p3 = scmp.lt.s32.totalorder %s474_s12, %s474_s12 }
  0x30   :  { %351 = vmatpush3.bf16.msra.mxu0 %v396_v3  ;;  %371 = vmatpush3.bf16.msra.mxu1 %v404_v8  ;;  %p481_p4 = por %p480_p3, %p479_p2 }
  0x31   :  { %352 = vmatprep.subr.bf16.mxu0 %v505_v0  ;;  %372 = vmatprep.subr.bf16.mxu1 %v505_v0 }
  0x32   :  { %p482_p5 = pnand %p481_p4, %p475_p1 }
  0x34   :  { %353 = vmatpush3.bf16.msra.mxu0 %v397_v5  ;;  %373 = vmatpush3.bf16.msra.mxu1 %v405_v10 }
  0x35   :  { %354 = vmatprep.subr.bf16.mxu0 %v505_v0  ;;  %374 = vmatprep.subr.bf16.mxu1 %v505_v0 }
  0x38   :  { %355 = vmatpush3.bf16.msra.mxu0 %v398_v7  ;;  %375 = vmatpush3.bf16.msra.mxu1 %v406_v12 }
  0x39   :  { %356 = vmatprep.subr.bf16.mxu0 %v505_v0  ;;  %376 = vmatprep.subr.bf16.mxu1 %v505_v0 }
  0x3c   :  { %357 = vmatpush3.bf16.msra.mxu0 %v399_v9  ;;  %377 = vmatpush3.bf16.msra.mxu1 %v407_v14 }
  0x3d   :  { %358 = vmatprep.subr.bf16.mxu0 %v505_v0  ;;  %378 = vmatprep.subr.bf16.mxu1 %v505_v0 }
  0x40   :  { %359 = vmatpush3.bf16.msra.mxu0 %v400_v11  ;;  %379 = vmatpush3.bf16.msra.mxu1 %v408_v16 }
  0x41   :  { %360 = vmatprep.subr.bf16.mxu0 %v505_v0  ;;  %380 = vmatprep.subr.bf16.mxu1 %v505_v0 }
  0x44   :  { %361 = vmatpush3.bf16.msra.mxu0 %v401_v13  ;;  %381 = vmatpush3.bf16.msra.mxu1 %v409_v17 }
  0x47   :  { %363 = vmatmul.mubr.bf16.vlgmr.msra.gmra.mxu0 %v61_v15 }
 0x107   :  { %v167_v19 = vpop.f32.mrf.mxu0 }
 0x108   :  { %v168_v20 = vadd.f32 %v309_v18, %v167_v19 }
 0x109   :  { %v364_v21 = vpop.f32.mrf.mxu0 }
 0x10a   :  { %v173_v22 = vmax.f32 %v168_v20, 0.0 }
 0x10b   :  { %v170_v23 = vpop.f32.mrf.mxu0 }
 0x10c   :  { %v174_v24 = vpack.c.bf16 %v173_v22, %v173_v22 }
 0x10d   :  { %v365_v25 = vpop.f32.mrf.mxu0 }
 0x10e   :  { %383 = vmatmul.mubr.bf16.vlgmr.msra.gmra.mxu1 %v174_v24 }
 0x1ce   :  { %v280_v27 = vpop.f32.mrf.mxu1 }
 0x1cf   :  { %v281_v28 = vadd.f32 %v318_v26, %v280_v27 }
 0x1d0   :  { %v384_v29 = vpop.f32.mrf.mxu1 }
 0x1d1   :  { %v327_v30 = vmul.f32 -1.442695, %v281_v28 }
 0x1d2   :  { %v283_v31 = vpop.f32.mrf.mxu1 }
 0x1d3   :  { %410 = vpow2.f32 %v327_v30 }
 0x1d4   :  { %v385_v32 = vpop.f32.mrf.mxu1 }
 0x1e0   :  { %v411_v33 = vpop.eup %410 }
 0x1e1   :  { %v289_v34 = vadd.f32 1.0, %v411_v33 }
 0x1e3   :  { %412 = vrcp.f32 %v289_v34 }
 0x1f0   :  { %v413_v35 = vpop.eup %412 }
 0x1f1   :  { %292 = vst [vmem:[#allocation8] sm:$0xff] %v413_v35 }
 0x1f2   :  { %485 = shalt.err (!%p482_p5)
}
 0x1f3   :  { %302 = dma.vmem_to_hbm [thread:$0]  %s300_s11, 128, %s561_s5, [#allocation4]  }
 0x1f4   :  { %498 = dma.done.wait [#allocation4], 128  }
 0x1f5   :  { %499 = vsyncadd [#allocation4], 4294967168 }
 0x1f6   :  { %306 = vsyncpa [#allocation3], 1 }
 0x1f7   :  { %307 = vsyncpa [#allocation6], 1 }
 0x1f8   :  { %308 = vsyncpa [#allocation4], 1 }

</bundles_post_ra>
